<compile_context>
chip_gen: v5e
topology: v5e:2x2
jax: 0.10.0
libtpu: 0.0.40
codegen_flags: <defaults>
</compile_context>

<pallas_src>
import functools
import math

import jax
import jax.numpy as jnp
from jax.experimental import pallas as pl
from jax.experimental.pallas import tpu as pltpu

HIDDEN1 = 64
HIDDEN2 = 32
TILE_B_MAX = 8192            # upper bound on rows per grid step
VMEM_TILE_BUDGET = 24 * 1024 * 1024   # double-buffered x+out bytes, fits all gens


def _round_up(n, m):
    return ((n + m - 1) // m) * m


def _choose_tile_b(B, D, out_dim):
    """Pick a batch tile that (a) fits the VMEM budget, (b) avoids padding
    blowups, and (c) gives v7x's two TensorCores >=2 grid steps for large B."""
    # Double-buffered f32 x tile + f32 out tile per row.
    bytes_per_row = 2 * 4 * (D + out_dim)
    max_rows_vmem = max(16, (VMEM_TILE_BUDGET // bytes_per_row) // 16 * 16)
    tile_cap = min(TILE_B_MAX, max_rows_vmem)

    n_steps = max(1, math.ceil(B / tile_cap))
    # v7x megacore: ensure >=2 steps once a tile is big enough that splitting
    # beats the ~0.35 us fixed per-step overhead.
    if n_steps == 1 and B >= 2048:
        n_steps = 2

    tile_b = _round_up(math.ceil(B / n_steps), 16)
    padded_b = _round_up(B, tile_b)
    return tile_b, padded_b


def _mlp_kernel(x_ref, w1_ref, b1_ref, w2_ref, b2_ref, w3_ref, b3_ref, o_ref):
    # Matmuls in bf16 on the MXU with f32 accumulation; bias add + ReLU stay in
    # f32 on the VPU (required on v5e, free on v6e/v7x).
    x = x_ref[...].astype(jnp.bfloat16)                                   # [T, D]
    h1 = jnp.dot(x, w1_ref[...], preferred_element_type=jnp.float32)     # [T, 64]
    h1 = jnp.maximum(h1 + b1_ref[...], 0.0)
    h2 = jnp.dot(h1.astype(jnp.bfloat16), w2_ref[...],
                 preferred_element_type=jnp.float32)                     # [T, 32]
    h2 = jnp.maximum(h2 + b2_ref[...], 0.0)
    out = jnp.dot(h2.astype(jnp.bfloat16), w3_ref[...],
                  preferred_element_type=jnp.float32) + b3_ref[...]      # [T, out]
    o_ref[...] = out


def prepare_params(params):
    """One-time weight preparation: bf16 weights, f32 (1, fan_out) biases."""
    w1, b1, w2, b2, w3, b3 = params
    return (w1.astype(jnp.bfloat16), b1.reshape(1, -1).astype(jnp.float32),
            w2.astype(jnp.bfloat16), b2.reshape(1, -1).astype(jnp.float32),
            w3.astype(jnp.bfloat16), b3.reshape(1, -1).astype(jnp.float32))


@functools.partial(jax.jit, static_argnames=())
def _forward_impl(x, w1_bf, b1, w2_bf, b2, w3_bf, b3):
    B, D = x.shape
    out_dim = w3_bf.shape[1]

    tile_b, padded_b = _choose_tile_b(B, D, out_dim)
    x_p = jnp.pad(x, ((0, padded_b - B), (0, 0))) if padded_b != B else x

    grid = (padded_b // tile_b,)

    def const_spec(shape):
        # Weights/biases: same block every step -> fetched once, VMEM-resident.
        return pl.BlockSpec(shape, lambda i: (0, 0))

    flops = 2 * padded_b * (D * HIDDEN1 + HIDDEN1 * HIDDEN2 + HIDDEN2 * out_dim)
    bytes_accessed = (
        padded_b * D * 4                                     # x (f32 in)
        + (w1_bf.size + w2_bf.size + w3_bf.size) * 2         # bf16 weights
        + (b1.size + b2.size + b3.size) * 4                  # f32 biases
        + padded_b * out_dim * 4                             # f32 out
    )

    out_padded = pl.pallas_call(
        _mlp_kernel,
        out_shape=jax.ShapeDtypeStruct((padded_b, out_dim), jnp.float32),
        grid=grid,
        in_specs=[
            pl.BlockSpec((tile_b, D), lambda i: (i, 0)),     # x: tiled along batch
            const_spec((D, HIDDEN1)),
            const_spec((1, HIDDEN1)),
            const_spec((HIDDEN1, HIDDEN2)),
            const_spec((1, HIDDEN2)),
            const_spec((HIDDEN2, out_dim)),
            const_spec((1, out_dim)),
        ],
        # True-width output: last block dim == full array dim (legal for any
        # out_dim); accepts masked vst but avoids 16-30x write amplification.
        out_specs=pl.BlockSpec((tile_b, out_dim), lambda i: (i, 0)),
        compiler_params=pltpu.CompilerParams(
            dimension_semantics=("parallel",),   # shard batch tiles over v7x's 2 TCs
            vmem_limit_bytes=32 * 1024 * 1024,   # explicit: v5e default is only 16 MiB
        ),
        cost_estimate=pl.CostEstimate(
            flops=flops, transcendentals=0, bytes_accessed=bytes_accessed),
    )(x_p, w1_bf, b1, w2_bf, b2, w3_bf, b3)

    # Drop padded (garbage) tail rows; columns are already the true width.
    return out_padded[:B] if padded_b != B else out_padded


def simple_nn_forward(x, prepared_params):
    """Fused, batch-tiled MLP forward. x: [B, input_dim] float32.
    prepared_params: output of prepare_params()."""
    return _forward_impl(x, *prepared_params)


def init_params(key, input_dim, output_dim):
    """Deterministic init mirroring nn.Linear's U(-1/sqrt(fan_in), 1/sqrt(fan_in))."""
    dims = [(input_dim, HIDDEN1), (HIDDEN1, HIDDEN2), (HIDDEN2, output_dim)]
    keys = jax.random.split(key, 2 * len(dims))
    params = []
    for i, (fan_in, fan_out) in enumerate(dims):
        bound = 1.0 / jnp.sqrt(jnp.float32(fan_in))
        w = jax.random.uniform(keys[2 * i], (fan_in, fan_out), jnp.float32,
                               minval=-bound, maxval=bound)
        b = jax.random.uniform(keys[2 * i + 1], (1, fan_out), jnp.float32,
                               minval=-bound, maxval=bound)
        params += [w, b]
    return tuple(params)


def _reference_forward_f32(x, params):
    w1, b1, w2, b2, w3, b3 = params
    h1 = jnp.maximum(x @ w1 + b1, 0.0)
    h2 = jnp.maximum(h1 @ w2 + b2, 0.0)
    return h2 @ w3 + b3


def _reference_forward_bf16(x, params):
    # Mirrors the kernel numerics: bf16 matmul inputs, f32 accumulation/elementwise.
    w1, b1, w2, b2, w3, b3 = params
    bf = jnp.bfloat16
    h1 = jnp.maximum(
        jnp.dot(x.astype(bf), w1.astype(bf), preferred_element_type=jnp.float32) + b1, 0.0)
    h2 = jnp.maximum(
        jnp.dot(h1.astype(bf), w2.astype(bf), preferred_element_type=jnp.float32) + b2, 0.0)
    return jnp.dot(h2.astype(bf), w3.astype(bf), preferred_element_type=jnp.float32) + b3


if __name__ == "__main__":
    # Small shapes consistent with the module: batch=8, input_dim=32, output_dim=8.
    B, INPUT_DIM, OUTPUT_DIM = 8, 32, 8

    key = jax.random.PRNGKey(0)
    k_x, k_p, k_x2 = jax.random.split(key, 3)
    x = jax.random.normal(k_x, (B, INPUT_DIM), jnp.float32)
    params = init_params(k_p, INPUT_DIM, OUTPUT_DIM)
    prepared = prepare_params(params)

    out = jax.block_until_ready(simple_nn_forward(x, prepared))
    assert out.shape == (B, OUTPUT_DIM)

    ref_bf16 = _reference_forward_bf16(x, params)
    ref_f32 = _reference_forward_f32(x, params)
    assert jnp.allclose(out, ref_bf16, atol=1e-3, rtol=1e-3)
    assert jnp.allclose(out, ref_f32, atol=5e-2, rtol=5e-2)

    # Exercise the batch-tail padding path (B not a multiple of the tile).
    B2 = 37
    x2 = jax.random.normal(k_x2, (B2, INPUT_DIM), jnp.float32)
    out2 = jax.block_until_ready(simple_nn_forward(x2, prepared))
    assert out2.shape == (B2, OUTPUT_DIM)
    assert jnp.allclose(out2, _reference_forward_bf16(x2, params), atol=1e-3, rtol=1e-3)

    # Exercise the multi-step grid / megacore path (forced >=2 steps at B>=2048).
    B3 = 2050
    x3 = jax.random.normal(k_x, (B3, INPUT_DIM), jnp.float32)
    out3 = jax.block_until_ready(simple_nn_forward(x3, prepared))
    assert out3.shape == (B3, OUTPUT_DIM)
    assert jnp.allclose(out3, _reference_forward_bf16(x3, params), atol=1e-3, rtol=1e-3)

    print("KERNEL_OK")
</pallas_src>

<mosaic_0001>
module attributes {stable_mosaic.version = 11 : i64} {
  func.func @_mlp_kernel(%arg0: i32, %arg1: memref<16x32xf32, #tpu.memory_space<vmem>>, %arg2: memref<32x64xbf16, #tpu.memory_space<vmem>>, %arg3: memref<1x64xf32, #tpu.memory_space<vmem>>, %arg4: memref<64x32xbf16, #tpu.memory_space<vmem>>, %arg5: memref<1x32xf32, #tpu.memory_space<vmem>>, %arg6: memref<32x8xbf16, #tpu.memory_space<vmem>>, %arg7: memref<1x8xf32, #tpu.memory_space<vmem>>, %arg8: memref<16x8xf32, #tpu.memory_space<vmem>>) attributes {dimension_semantics = [#tpu.dimension_semantics<parallel>], iteration_bounds = array<i64: 1>, scalar_prefetch = 0 : i64, scratch_operands = 0 : i64, tpu.core_type = #tpu.core_type<tc>, window_params = [{transform_indices = @transform_0, window_bounds = array<i64: 16, 32>}, {pipeline_mode = #tpu.pipeline_mode<synchronous>, transform_indices = @transform_1, window_bounds = array<i64: 32, 64>}, {pipeline_mode = #tpu.pipeline_mode<synchronous>, transform_indices = @transform_2, window_bounds = array<i64: 1, 64>}, {pipeline_mode = #tpu.pipeline_mode<synchronous>, transform_indices = @transform_3, window_bounds = array<i64: 64, 32>}, {pipeline_mode = #tpu.pipeline_mode<synchronous>, transform_indices = @transform_4, window_bounds = array<i64: 1, 32>}, {pipeline_mode = #tpu.pipeline_mode<synchronous>, transform_indices = @transform_5, window_bounds = array<i64: 32, 8>}, {pipeline_mode = #tpu.pipeline_mode<synchronous>, transform_indices = @transform_6, window_bounds = array<i64: 1, 8>}, {transform_indices = @transform_7, window_bounds = array<i64: 16, 8>}]} {
    %c0 = arith.constant 0 : index
    %c0_0 = arith.constant 0 : index
    %0 = vector.load %arg1[%c0, %c0_0] : memref<16x32xf32, #tpu.memory_space<vmem>>, vector<16x32xf32>
    %1 = arith.truncf %0 : vector<16x32xf32> to vector<16x32xbf16>
    %c0_1 = arith.constant 0 : index
    %c0_2 = arith.constant 0 : index
    %2 = vector.load %arg2[%c0_1, %c0_2] : memref<32x64xbf16, #tpu.memory_space<vmem>>, vector<32x64xbf16>
    %cst = arith.constant dense<0.000000e+00> : vector<16x64xf32>
    %3 = tpu.matmul %1, %2, %cst {dimension_numbers = #tpu.dot_dimension_numbers<[1], [0], [0], [1], [0, 0, 1, 1], [], []>} : vector<16x32xbf16>, vector<32x64xbf16>, vector<16x64xf32> -> vector<16x64xf32>
    %c0_3 = arith.constant 0 : index
    %c0_4 = arith.constant 0 : index
    %4 = vector.load %arg3[%c0_3, %c0_4] : memref<1x64xf32, #tpu.memory_space<vmem>>, vector<1x64xf32>
    %5 = vector.broadcast %4 : vector<1x64xf32> to vector<16x64xf32>
    %6 = arith.addf %3, %5 : vector<16x64xf32>
    %cst_5 = arith.constant 0.000000e+00 : f32
    %7 = vector.broadcast %cst_5 : f32 to vector<16x64xf32>
    %8 = arith.maximumf %6, %7 : vector<16x64xf32>
    %9 = arith.truncf %8 : vector<16x64xf32> to vector<16x64xbf16>
    %c0_6 = arith.constant 0 : index
    %c0_7 = arith.constant 0 : index
    %10 = vector.load %arg4[%c0_6, %c0_7] : memref<64x32xbf16, #tpu.memory_space<vmem>>, vector<64x32xbf16>
    %cst_8 = arith.constant dense<0.000000e+00> : vector<16x32xf32>
    %11 = tpu.matmul %9, %10, %cst_8 {dimension_numbers = #tpu.dot_dimension_numbers<[1], [0], [0], [1], [0, 0, 1, 1], [], []>} : vector<16x64xbf16>, vector<64x32xbf16>, vector<16x32xf32> -> vector<16x32xf32>
    %c0_9 = arith.constant 0 : index
    %c0_10 = arith.constant 0 : index
    %12 = vector.load %arg5[%c0_9, %c0_10] : memref<1x32xf32, #tpu.memory_space<vmem>>, vector<1x32xf32>
    %13 = vector.broadcast %12 : vector<1x32xf32> to vector<16x32xf32>
    %14 = arith.addf %11, %13 : vector<16x32xf32>
    %cst_11 = arith.constant 0.000000e+00 : f32
    %15 = vector.broadcast %cst_11 : f32 to vector<16x32xf32>
    %16 = arith.maximumf %14, %15 : vector<16x32xf32>
    %17 = arith.truncf %16 : vector<16x32xf32> to vector<16x32xbf16>
    %c0_12 = arith.constant 0 : index
    %c0_13 = arith.constant 0 : index
    %18 = vector.load %arg6[%c0_12, %c0_13] : memref<32x8xbf16, #tpu.memory_space<vmem>>, vector<32x8xbf16>
    %cst_14 = arith.constant dense<0.000000e+00> : vector<16x8xf32>
    %19 = tpu.matmul %17, %18, %cst_14 {dimension_numbers = #tpu.dot_dimension_numbers<[1], [0], [0], [1], [0, 0, 1, 1], [], []>} : vector<16x32xbf16>, vector<32x8xbf16>, vector<16x8xf32> -> vector<16x8xf32>
    %c0_15 = arith.constant 0 : index
    %c0_16 = arith.constant 0 : index
    %20 = vector.load %arg7[%c0_15, %c0_16] : memref<1x8xf32, #tpu.memory_space<vmem>>, vector<1x8xf32>
    %21 = vector.broadcast %20 : vector<1x8xf32> to vector<16x8xf32>
    %22 = arith.addf %19, %21 : vector<16x8xf32>
    %c0_17 = arith.constant 0 : index
    %c0_18 = arith.constant 0 : index
    %23 = vector.load %arg8[%c0_17, %c0_18] : memref<16x8xf32, #tpu.memory_space<vmem>>, vector<16x8xf32>
    tpu.vector_store %arg8[%c0_17, %c0_18], %22 {strides = array<i32>} : memref<16x8xf32, #tpu.memory_space<vmem>>, vector<16x8xf32>,
    return
  }
  func.func @transform_0(%arg0: i32) -> (i32, i32) {
    %c0_i32 = arith.constant 0 : i32
    %c0_i32_0 = arith.constant 0 : i32
    return %arg0, %c0_i32 : i32, i32
  }
  func.func @transform_1(%arg0: i32) -> (i32, i32) {
    %c0_i32 = arith.constant 0 : i32
    %c0_i32_0 = arith.constant 0 : i32
    %c0_i32_1 = arith.constant 0 : i32
    return %c0_i32, %c0_i32_0 : i32, i32
  }
  func.func @transform_2(%arg0: i32) -> (i32, i32) {
    %c0_i32 = arith.constant 0 : i32
    %c0_i32_0 = arith.constant 0 : i32
    %c0_i32_1 = arith.constant 0 : i32
    return %c0_i32, %c0_i32_0 : i32, i32
  }
  func.func @transform_3(%arg0: i32) -> (i32, i32) {
    %c0_i32 = arith.constant 0 : i32
    %c0_i32_0 = arith.constant 0 : i32
    %c0_i32_1 = arith.constant 0 : i32
    return %c0_i32, %c0_i32_0 : i32, i32
  }
  func.func @transform_4(%arg0: i32) -> (i32, i32) {
    %c0_i32 = arith.constant 0 : i32
    %c0_i32_0 = arith.constant 0 : i32
    %c0_i32_1 = arith.constant 0 : i32
    return %c0_i32, %c0_i32_0 : i32, i32
  }
  func.func @transform_5(%arg0: i32) -> (i32, i32) {
    %c0_i32 = arith.constant 0 : i32
    %c0_i32_0 = arith.constant 0 : i32
    %c0_i32_1 = arith.constant 0 : i32
    return %c0_i32, %c0_i32_0 : i32, i32
  }
  func.func @transform_6(%arg0: i32) -> (i32, i32) {
    %c0_i32 = arith.constant 0 : i32
    %c0_i32_0 = arith.constant 0 : i32
    %c0_i32_1 = arith.constant 0 : i32
    return %c0_i32, %c0_i32_0 : i32, i32
  }
  func.func @transform_7(%arg0: i32) -> (i32, i32) {
    %c0_i32 = arith.constant 0 : i32
    %c0_i32_0 = arith.constant 0 : i32
    return %arg0, %c0_i32 : i32, i32
  }
}

</mosaic_0001>

<bundles_post_ra>
// kernel: _forward_impl.1
= control target key start
LH: loop header
LB: loop body
LE: loop exit
PB: predicated region body
PF: predicated region fallthrough
CT: control target
= control target key end

     0   :  { %vm50_vm0 = vcmask 261120   ;;  %vm107_vm1 = vcmask 523264   ;;  %vm165_vm2 = vcmask 64512   ;;  %s305_s1 = inlined_call_operand.vmem [shape: bf16[32,64], index: 1, kind: input, shape index: {}]   ;;  %s306_s0 = inlined_call_operand.vmem [shape: f32[16,32], index: 0, kind: input, shape index: {}]   ;;  %s307_s2 = inlined_call_operand.vmem [shape: f32[1,64], index: 2, kind: input, shape index: {}]   ;;  %s308_s4 = inlined_call_operand.vmem [shape: f32[1,32], index: 4, kind: input, shape index: {}]   ;;  %s309_s3 = inlined_call_operand.vmem [shape: bf16[64,32], index: 3, kind: input, shape index: {}]   ;;  %s310_s6 = inlined_call_operand.vmem [shape: f32[1,8], index: 6, kind: input, shape index: {}]   ;;  %s311_s5 = inlined_call_operand.vmem [shape: bf16[32,8], index: 5, kind: input, shape index: {}]   ;;  %s312_s7 = inlined_call_operand.vmem [shape: f32[16,8], index: 7, kind: output, shape index: {}]  }
   0x1   :  { %v208_v0 = vld [vmem:[%s305_s1 + $0x8] sm:$0xff]  ;;  %v207_v1 = vld [vmem:[%s305_s1] sm:$0xff]  ;;  %v212_v5 = vld [vmem:[%s309_s3 + $0x18] sm:$0xff] }
   0x2   :  { %60 = vmatpush.bf16.msra.mxu0 %v208_v0  ;;  %v27_v2 = vld [vmem:[%s306_s0] sm:$0xff]  ;;  %v28_v3 = vld [vmem:[%s306_s0 + $0x8] sm:$0xff]  ;;  %115 = vmatpush.bf16.msra.mxu1 %v212_v5  ;;  %v211_v6 = vld [vmem:[%s309_s3 + $0x10] sm:$0xff] }
   0x3   :  { %v29_v4 = vpack.c.bf16 %v28_v3, %v27_v2  ;;  %v210_v7 = vld [vmem:[%s309_s3 + $0x8] sm:$0xff]  ;;  %v209_v8 = vld [vmem:[%s309_s3] sm:$0xff] }
   0x4   :  { %v215_v10 = vld [vmem:[%s307_s2] ss:$0 sm:$0xff]  ;;  %v214_v17 = vld [vmem:[%s311_s5 + $0x8] sm:$0xff] }
   0x5   :  { %157 = vmatpush.bf16.msra.mxu2 %v214_v17  ;;  %v213_v18 = vld [vmem:[%s311_s5] sm:$0xff] }
   0x6   :  { %61 = vmatpush.bf16.msra.mxu0 %v207_v1  ;;  %116 = vmatpush.bf16.msra.mxu1 %v211_v6  ;;  %v216_v20 = vld [vmem:[%s308_s4] ss:$0 sm:$0xff] }
   0x7   :  { %v217_v27 = vld [vmem:[%s310_s6] ss:$0 sm:$0xff] }
   0x9   :  { %180 = vmatmul.msk.bf16.vlgmr.msra.gmra.mxu0 %vm50_vm0, %v29_v4  ;;  %158 = vmatpush.bf16.msra.mxu2 %v213_v18 }
   0xa   :  { %117 = vmatpush.bf16.msra.mxu1 %v210_v7 }
   0xe   :  { %118 = vmatpush.bf16.msra.mxu1 %v209_v8 }
  0x86   :  { %v63_v9 = vpop.f32.mrf.mxu0 }
  0x87   :  { %v64_v11 = vadd.f32 %v215_v10, %v63_v9 }
  0x89   :  { %v68_v14 = vmax.f32 %v64_v11, 0.0 }
  0x8e   :  { %v65_v12 = vpop.f32.mrf.mxu0 }
  0x8f   :  { %v66_v13 = vadd.f32 %v215_v10, %v65_v12 }
  0x91   :  { %v69_v15 = vmax.f32 %v66_v13, 0.0 }
  0x93   :  { %v70_v16 = vpack.c.bf16 %v69_v15, %v68_v14 }
  0x95   :  { %197 = vmatmul.msk.bf16.vlgmr.msra.gmra.mxu1 %vm107_vm1, %v70_v16 }
 0x112   :  { %v120_v19 = vpop.f32.mrf.mxu1 }
 0x113   :  { %v121_v21 = vadd.f32 %v216_v20, %v120_v19 }
 0x115   :  { %v125_v24 = vmax.f32 %v121_v21, 0.0 }
 0x11a   :  { %v122_v22 = vpop.f32.mrf.mxu1 }
 0x11b   :  { %v123_v23 = vadd.f32 %v216_v20, %v122_v22 }
 0x11d   :  { %v126_v25 = vmax.f32 %v123_v23, 0.0 }
 0x11f   :  { %v127_v26 = vpack.c.bf16 %v126_v25, %v125_v24 }
 0x121   :  { %206 = vmatmul.msk.bf16.vlgmr.msra.gmra.mxu2 %vm50_vm0, %v127_v26 }
 0x1a4   :  { %v160_v28 = vpop.f32.mrf.mxu2 }
 0x1a5   :  { %v161_v29 = vadd.f32 %v217_v27, %v160_v28 }
 0x1a7   :  { %166 = vst.msk [vmem:[%s312_s7] sm:$0xff] %vm165_vm2, %v161_v29 }
 0x1ac   :  { %v162_v30 = vpop.f32.mrf.mxu2 }
 0x1ad   :  { %v163_v31 = vadd.f32 %v217_v27, %v162_v30 }
 0x1af   :  { %167 = vst.msk [vmem:[%s312_s7 + $0x8] sm:$0xff] %vm165_vm2, %v163_v31 }

</bundles_post_ra>
